<compile_context>
chip_gen: v5e
topology: v5e:2x2
jax: 0.10.0
libtpu: 0.0.40
codegen_flags: <defaults>
</compile_context>

<pallas_src>
import functools

import jax
import jax.numpy as jnp
from jax.experimental import pallas as pl
from jax.experimental.pallas import tpu as pltpu


# --------------------------------------------------------------------------- #
# Kernel
# --------------------------------------------------------------------------- #
def _pixel_shuffle_kernel(x_ref, o_ref, *, r, w_chunk):
    # x_ref: (C_t * r*r, H_t, W)   -- C_t contiguous groups of r*r input chans.
    # o_ref: (C_t, H_t, r*r*W)     -- same bytes as the (C_t, H_t*r, W*r) output.
    K, Ht, W = x_ref.shape
    rr = r * r
    C_t = K // rr
    rW = r * W
    Wc = w_chunk
    rWc = r * Wc
    p_dtype = x_ref.dtype

    # Constant 0/1 width-interleave matrices: P_j[w, m] = 1  iff  m == w*r + j.
    # Built once per grid step (cheap VPU iota+compare) and reused by every
    # (channel, sub-row, w-chunk) matmul below.  Multiplying by 0/1 on the MXU
    # is exact, keeps the XLU completely idle, and avoids the relayout-heavy
    # expand/concat/reshape chains of the previous version.
    col = jax.lax.broadcasted_iota(jnp.int32, (Wc, rWc), 1)
    row = jax.lax.broadcasted_iota(jnp.int32, (Wc, rWc), 0)
    interleave = [(col == row * r + j).astype(p_dtype) for j in range(r)]

    def per_channel(c, carry):
        for i in range(r):                        # output sub-row   (static)
            for w0 in range(0, W, Wc):            # contraction tile (static)
                acc = jnp.zeros((Ht, rWc), jnp.float32)
                for j in range(r):                # input sub-column (static)
                    lhs = x_ref[c * rr + i * r + j, :, w0:w0 + Wc]   # (Ht, Wc)
                    acc += jnp.dot(
                        lhs,
                        interleave[j],
                        preferred_element_type=jnp.float32,
                        precision=jax.lax.Precision.HIGHEST,
                    )
                q0 = i * rW + w0 * r
                o_ref[c, :, q0:q0 + rWc] = acc.astype(o_ref.dtype)
        return carry

    jax.lax.fori_loop(0, C_t, per_channel, 0)


# --------------------------------------------------------------------------- #
# Tiling / VMEM planning
# --------------------------------------------------------------------------- #
def _divisors_desc(n):
    return [d for d in range(n, 0, -1) if n % d == 0]


def _vmem_capacity_bytes():
    try:
        cap = int(getattr(pltpu.get_tpu_info(), "vmem_capacity_bytes", 0))
        if cap > 0:
            return cap
    except Exception:
        pass
    return 64 * 1024 * 1024          # conservative fallback (v7x per-core VMEM)


def _pick_w_chunk(W, max_chunk=256):
    """Contraction tile: bounds MXU FLOPs/elem and the P-matrix footprint."""
    if W <= max_chunk:
        return W
    for wc in range(max_chunk, max_chunk // 4, -1):
        if W % wc == 0:
            return wc
    return W                          # awkward W: fall back to a single chunk


def _plan_tiles(N, C_out, H, W, r, itemsize, target_bytes):
    """Pick (C_t, H_t): the biggest blocks that fit the budget, >= 4 steps."""
    rr = r * r
    sub = max(8, 32 // itemsize)              # dtype-aware sublane multiple
    row_bytes = rr * W * itemsize             # one input row-group (== out row)
    group_bytes = H * row_bytes               # one full output channel

    # Row tile: full H if it fits, else the largest clean divisor that does.
    if group_bytes <= target_bytes:
        h_t = H
    else:
        cands = [h for h in _divisors_desc(H) if h % sub == 0]
        fitting = [h for h in cands if h * row_bytes <= target_bytes]
        h_t = fitting[0] if fitting else (cands[-1] if cands else H)

    # Channel tile: largest divisor of C_out whose block fits the budget.
    blk = h_t * row_bytes
    fitting = [c for c in _divisors_desc(C_out) if c * blk <= target_bytes]
    c_t = fitting[0] if fitting else 1

    # Keep >= 4 grid steps so both v7x TensorCores get work (megacore).
    def steps(c, h):
        return N * (C_out // c) * (H // h)

    for c in _divisors_desc(C_out):
        if steps(c_t, h_t) >= 4:
            break
        if c < c_t:
            c_t = c
    if steps(c_t, h_t) < 4:
        for h in _divisors_desc(H):
            if steps(c_t, h_t) >= 4:
                break
            if h < h_t and h % sub == 0:
                h_t = h
    return c_t, h_t


# --------------------------------------------------------------------------- #
# Public wrapper (== PixelShuffule.forward)
# --------------------------------------------------------------------------- #
def pixel_shuffle(x, scale_factor):
    N, C_in, H, W = x.shape
    r = int(scale_factor)
    rr = r * r
    if C_in % rr != 0:
        raise ValueError("C_in must be divisible by scale_factor**2")
    if not jnp.issubdtype(x.dtype, jnp.floating):
        # TODO(synk): integer dtypes would need an exact non-MXU shuffle path.
        raise NotImplementedError("pixel_shuffle kernel supports float dtypes")

    C_out = C_in // rr
    Q = rr * W
    itemsize = jnp.dtype(x.dtype).itemsize

    w_chunk = _pick_w_chunk(W)
    p_bytes = r * w_chunk * (r * w_chunk) * itemsize     # interleave matrices
    reserve = 2 * 1024 * 1024

    cap = _vmem_capacity_bytes()
    # ~96 MiB scoped limit on 128 MiB chips (v5e/v6e), ~54 MiB on v7x (64 MiB).
    vmem_limit = min(cap - 10 * 1024 * 1024, 96 * 1024 * 1024)
    # Per-step budget: 2x input block + 2x output block (double-buffered) + P.
    target = max(1 << 20, (vmem_limit - p_bytes - reserve) // 5)

    c_t, h_t = _plan_tiles(N, C_out, H, W, r, itemsize, target)
    block_bytes = c_t * rr * h_t * W * itemsize
    need = 4 * block_bytes + p_bytes + reserve
    if need > cap:
        raise ValueError(
            f"pixel_shuffle: minimum tile needs ~{need >> 20} MiB VMEM but the "
            f"chip only has {cap >> 20} MiB; reduce W or scale_factor")
    vmem_limit = max(vmem_limit, min(need, cap - 4 * 1024 * 1024))

    grid = (N, C_out // c_t, H // h_t)
    kernel = functools.partial(_pixel_shuffle_kernel, r=r, w_chunk=w_chunk)

    out = pl.pallas_call(
        kernel,
        # (N, C_out, H, r*r*W) is row-major identical to (N, C_out, H*r, W*r).
        out_shape=jax.ShapeDtypeStruct((N, C_out, H, Q), x.dtype),
        grid=grid,
        in_specs=[
            pl.BlockSpec((None, c_t * rr, h_t, W), lambda n, c, h: (n, c, h, 0)),
        ],
        out_specs=pl.BlockSpec((None, c_t, h_t, Q), lambda n, c, h: (n, c, h, 0)),
        compiler_params=pltpu.CompilerParams(
            dimension_semantics=("parallel", "parallel", "parallel"),
            vmem_limit_bytes=int(vmem_limit),
        ),
    )(x)
    # Free (metadata-only) reshape back to the NCHW pixel-shuffled layout.
    return out.reshape(N, C_out, H * r, W * r)


# --------------------------------------------------------------------------- #
# Reference + self-test
# --------------------------------------------------------------------------- #
def _reference(x, r):
    # Pure-JAX reference matching torch.nn.PixelShuffle semantics.
    N, C_in, H, W = x.shape
    C_out = C_in // (r * r)
    y = x.reshape(N, C_out, r, r, H, W)
    y = jnp.transpose(y, (0, 1, 4, 2, 5, 3))
    return y.reshape(N, C_out, H * r, W * r)


if __name__ == "__main__":
    key = jax.random.PRNGKey(0)
    k1, k2 = jax.random.split(key)

    # Test 1: f32, r=2, narrow map (exercises masked sub-128 lane stores).
    # Values are snapped to the bf16 grid so the 0/1-matmul shuffle is exact
    # under any matmul precision mode.
    x1 = (jax.random.normal(k1, (2, 16, 8, 8), jnp.float32)
          .astype(jnp.bfloat16).astype(jnp.float32))
    o1 = jax.block_until_ready(pixel_shuffle(x1, 2))
    assert o1.shape == (2, 4, 16, 16), o1.shape
    assert jnp.allclose(o1, _reference(x1, 2)), "mismatch (f32, r=2)"

    # Test 2: bf16, r=3, wider map (exercises 128-aligned chunked lane stores).
    x2 = jax.random.normal(k2, (1, 18, 16, 128), jnp.float32).astype(jnp.bfloat16)
    o2 = jax.block_until_ready(pixel_shuffle(x2, 3))
    assert o2.shape == (1, 2, 48, 384), o2.shape
    assert jnp.allclose(o2.astype(jnp.float32),
                        _reference(x2.astype(jnp.float32), 3)), "mismatch (bf16, r=3)"

    print("KERNEL_OK")
</pallas_src>

<mosaic_0001>
module attributes {stable_mosaic.version = 11 : i64} {
  func.func @_pixel_shuffle_kernel(%arg0: i32, %arg1: i32, %arg2: i32, %arg3: memref<1x8x8x8xf32, #tpu.memory_space<vmem>>, %arg4: memref<1x2x8x32xf32, #tpu.memory_space<vmem>>) attributes {dimension_semantics = [#tpu.dimension_semantics<parallel>, #tpu.dimension_semantics<parallel>, #tpu.dimension_semantics<parallel>], iteration_bounds = array<i64: 2, 2, 1>, scalar_prefetch = 0 : i64, scratch_operands = 0 : i64, tpu.core_type = #tpu.core_type<tc>, window_params = [{transform_indices = @transform_0, window_bounds = array<i64: 1, 8, 8, 8>}, {transform_indices = @transform_1, window_bounds = array<i64: 1, 2, 8, 32>}]} {
    %0 = tpu.iota {dimensions = array<i32: 1>} : vector<8x16xi32>
    %1 = tpu.iota {dimensions = array<i32: 0>} : vector<8x16xi32>
    %c2_i32 = arith.constant 2 : i32
    %2 = vector.broadcast %c2_i32 : i32 to vector<8x16xi32>
    %3 = arith.muli %1, %2 : vector<8x16xi32>
    %c0_i32 = arith.constant 0 : i32
    %4 = vector.broadcast %c0_i32 : i32 to vector<8x16xi32>
    %5 = arith.addi %3, %4 : vector<8x16xi32>
    %6 = arith.cmpi eq, %0, %5 : vector<8x16xi32>
    %7 = arith.extui %6 : vector<8x16xi1> to vector<8x16xi32>
    %8 = arith.sitofp %7 : vector<8x16xi32> to vector<8x16xf32>
    %c2_i32_0 = arith.constant 2 : i32
    %9 = vector.broadcast %c2_i32_0 : i32 to vector<8x16xi32>
    %10 = arith.muli %1, %9 : vector<8x16xi32>
    %c1_i32 = arith.constant 1 : i32
    %11 = vector.broadcast %c1_i32 : i32 to vector<8x16xi32>
    %12 = arith.addi %10, %11 : vector<8x16xi32>
    %13 = arith.cmpi eq, %0, %12 : vector<8x16xi32>
    %14 = arith.extui %13 : vector<8x16xi1> to vector<8x16xi32>
    %15 = arith.sitofp %14 : vector<8x16xi32> to vector<8x16xf32>
    %c0_i32_1 = arith.constant 0 : i32
    %c2_i32_2 = arith.constant 2 : i32
    %16 = arith.addi %c0_i32_1, %c2_i32_2 : i32
    %c1_i32_3 = arith.constant 1 : i32
    scf.for %arg5 = %c0_i32_1 to %16 step %c1_i32_3  : i32 {
      %cst = arith.constant 0.000000e+00 : f32
      %17 = vector.broadcast %cst : f32 to vector<8x16xf32>
      %c4_i32 = arith.constant 4 : i32
      %18 = arith.muli %arg5, %c4_i32 : i32
      %c0_i32_5 = arith.constant 0 : i32
      %19 = arith.addi %18, %c0_i32_5 : i32
      %c0_i32_6 = arith.constant 0 : i32
      %20 = arith.addi %19, %c0_i32_6 : i32
      %c0 = arith.constant 0 : index
      %21 = arith.index_cast %20 : i32 to index
      %c0_7 = arith.constant 0 : index
      %c0_8 = arith.constant 0 : index
      %22 = vector.load %arg3[%c0, %21, %c0_7, %c0_8] : memref<1x8x8x8xf32, #tpu.memory_space<vmem>>, vector<1x1x8x8xf32>
      %23 = vector.shape_cast %22 : vector<1x1x8x8xf32> to vector<8x8xf32>
      %cst_9 = arith.constant dense<0.000000e+00> : vector<8x16xf32>
      %24 = tpu.matmul %23, %8, %cst_9 {dimension_numbers = #tpu.dot_dimension_numbers<[1], [0], [0], [1], [0, 0, 1, 1], [], []>, precision = #tpu.contract_precision<fp32>} : vector<8x8xf32>, vector<8x16xf32>, vector<8x16xf32> -> vector<8x16xf32>
      %25 = arith.addf %17, %24 : vector<8x16xf32>
      %c4_i32_10 = arith.constant 4 : i32
      %26 = arith.muli %arg5, %c4_i32_10 : i32
      %c0_i32_11 = arith.constant 0 : i32
      %27 = arith.addi %26, %c0_i32_11 : i32
      %c1_i32_12 = arith.constant 1 : i32
      %28 = arith.addi %27, %c1_i32_12 : i32
      %c0_13 = arith.constant 0 : index
      %29 = arith.index_cast %28 : i32 to index
      %c0_14 = arith.constant 0 : index
      %c0_15 = arith.constant 0 : index
      %30 = vector.load %arg3[%c0_13, %29, %c0_14, %c0_15] : memref<1x8x8x8xf32, #tpu.memory_space<vmem>>, vector<1x1x8x8xf32>
      %31 = vector.shape_cast %30 : vector<1x1x8x8xf32> to vector<8x8xf32>
      %cst_16 = arith.constant dense<0.000000e+00> : vector<8x16xf32>
      %32 = tpu.matmul %31, %15, %cst_16 {dimension_numbers = #tpu.dot_dimension_numbers<[1], [0], [0], [1], [0, 0, 1, 1], [], []>, precision = #tpu.contract_precision<fp32>} : vector<8x8xf32>, vector<8x16xf32>, vector<8x16xf32> -> vector<8x16xf32>
      %33 = arith.addf %25, %32 : vector<8x16xf32>
      %c0_17 = arith.constant 0 : index
      %34 = arith.index_cast %arg5 : i32 to index
      %c0_18 = arith.constant 0 : index
      %c0_19 = arith.constant 0 : index
      %35 = vector.load %arg4[%c0_17, %34, %c0_18, %c0_19] : memref<1x2x8x32xf32, #tpu.memory_space<vmem>>, vector<1x1x8x16xf32>
      %36 = vector.shape_cast %35 : vector<1x1x8x16xf32> to vector<8x16xf32>
      %37 = vector.shape_cast %33 : vector<8x16xf32> to vector<1x1x8x16xf32>
      tpu.vector_store %arg4[%c0_17, %34, %c0_18, %c0_19], %37 {strides = array<i32>} : memref<1x2x8x32xf32, #tpu.memory_space<vmem>>, vector<1x1x8x16xf32>,
      %cst_20 = arith.constant 0.000000e+00 : f32
      %38 = vector.broadcast %cst_20 : f32 to vector<8x16xf32>
      %c4_i32_21 = arith.constant 4 : i32
      %39 = arith.muli %arg5, %c4_i32_21 : i32
      %c2_i32_22 = arith.constant 2 : i32
      %40 = arith.addi %39, %c2_i32_22 : i32
      %c0_i32_23 = arith.constant 0 : i32
      %41 = arith.addi %40, %c0_i32_23 : i32
      %c0_24 = arith.constant 0 : index
      %42 = arith.index_cast %41 : i32 to index
      %c0_25 = arith.constant 0 : index
      %c0_26 = arith.constant 0 : index
      %43 = vector.load %arg3[%c0_24, %42, %c0_25, %c0_26] : memref<1x8x8x8xf32, #tpu.memory_space<vmem>>, vector<1x1x8x8xf32>
      %44 = vector.shape_cast %43 : vector<1x1x8x8xf32> to vector<8x8xf32>
      %cst_27 = arith.constant dense<0.000000e+00> : vector<8x16xf32>
      %45 = tpu.matmul %44, %8, %cst_27 {dimension_numbers = #tpu.dot_dimension_numbers<[1], [0], [0], [1], [0, 0, 1, 1], [], []>, precision = #tpu.contract_precision<fp32>} : vector<8x8xf32>, vector<8x16xf32>, vector<8x16xf32> -> vector<8x16xf32>
      %46 = arith.addf %38, %45 : vector<8x16xf32>
      %c4_i32_28 = arith.constant 4 : i32
      %47 = arith.muli %arg5, %c4_i32_28 : i32
      %c2_i32_29 = arith.constant 2 : i32
      %48 = arith.addi %47, %c2_i32_29 : i32
      %c1_i32_30 = arith.constant 1 : i32
      %49 = arith.addi %48, %c1_i32_30 : i32
      %c0_31 = arith.constant 0 : index
      %50 = arith.index_cast %49 : i32 to index
      %c0_32 = arith.constant 0 : index
      %c0_33 = arith.constant 0 : index
      %51 = vector.load %arg3[%c0_31, %50, %c0_32, %c0_33] : memref<1x8x8x8xf32, #tpu.memory_space<vmem>>, vector<1x1x8x8xf32>
      %52 = vector.shape_cast %51 : vector<1x1x8x8xf32> to vector<8x8xf32>
      %cst_34 = arith.constant dense<0.000000e+00> : vector<8x16xf32>
      %53 = tpu.matmul %52, %15, %cst_34 {dimension_numbers = #tpu.dot_dimension_numbers<[1], [0], [0], [1], [0, 0, 1, 1], [], []>, precision = #tpu.contract_precision<fp32>} : vector<8x8xf32>, vector<8x16xf32>, vector<8x16xf32> -> vector<8x16xf32>
      %54 = arith.addf %46, %53 : vector<8x16xf32>
      %c0_35 = arith.constant 0 : index
      %55 = arith.index_cast %arg5 : i32 to index
      %c0_36 = arith.constant 0 : index
      %c16 = arith.constant 16 : index
      %56 = vector.load %arg4[%c0_35, %55, %c0_36, %c16] : memref<1x2x8x32xf32, #tpu.memory_space<vmem>>, vector<1x1x8x16xf32>
      %57 = vector.shape_cast %56 : vector<1x1x8x16xf32> to vector<8x16xf32>
      %58 = vector.shape_cast %54 : vector<8x16xf32> to vector<1x1x8x16xf32>
      tpu.vector_store %arg4[%c0_35, %55, %c0_36, %c16], %58 {strides = array<i32>} : memref<1x2x8x32xf32, #tpu.memory_space<vmem>>, vector<1x1x8x16xf32>,
    }
    %c2_i32_4 = arith.constant 2 : i32
    return
  }
  func.func @transform_0(%arg0: i32, %arg1: i32, %arg2: i32) -> (i32, i32, i32, i32) {
    %c0_i32 = arith.constant 0 : i32
    %c0_i32_0 = arith.constant 0 : i32
    return %arg0, %arg1, %arg2, %c0_i32 : i32, i32, i32, i32
  }
  func.func @transform_1(%arg0: i32, %arg1: i32, %arg2: i32) -> (i32, i32, i32, i32) {
    %c0_i32 = arith.constant 0 : i32
    %c0_i32_0 = arith.constant 0 : i32
    return %arg0, %arg1, %arg2, %c0_i32 : i32, i32, i32, i32
  }
}

</mosaic_0001>

<bundles_post_ra>
// kernel: tpu_custom_call.1
= control target key start
LH: loop header
LB: loop body
LE: loop exit
PB: predicated region body
PF: predicated region fallthrough
CT: control target
= control target key end

     0   :  { %6 = vsyncpa [#allocation3], 0  ;;  %s1410_s0 = inlined_call_operand.vmem [shape: f32[2,16,8,8], index: 0, kind: input, shape index: {}]   ;;  %s1411_s1 = inlined_call_operand.hbm [shape: f32[2,4,8,32], index: 1, kind: output, shape index: {}]  }
   0x1   :  { %8 = vsyncpa [#allocation3 + $0x1], 0  ;;  %s1184_s6 = smov 0   ;;  %s1186_s7 = smov 0  }
   0x2   :  { %s1188_s8 = smov 0   ;;  %s1190_s9 = smov 0  }
   0x3   :  { %s1192_s10 = smov 0   ;;  %s1194_s11 = smov 0  }
   0x4   :  { %s1196_s12 = smov 0   ;;  %s1198_s13 = smov 0  }
   0x5 LB: > { %s936_s14 = sadd.s32 4294967295, %s1163_s13   ;;  %s937_s15 = sadd.s32 4294967294, %s1163_s13   ;;  %s1163_s13 = sphi %s1198_s13, %s14_s13   ;;  %s1159_s12 = sphi %s1196_s12, %s1424_s12   ;;  %s1155_s11 = sphi %s1194_s11, %s1423_s11   ;;  %s1151_s10 = sphi %s1192_s10, %s1422_s10   ;;  %s1147_s9 = sphi %s1190_s9, %s1421_s9   ;;  %s1143_s8 = sphi %s1188_s8, %s1420_s8   ;;  %s1139_s7 = sphi %s1186_s7, %s1419_s7   ;;  %s1135_s6 = sphi %s1184_s6, %s1418_s6  }
   0x6   : > { %s29_s16 = sadd.s32 1, %s1155_s11  ;;  %s33_s17 = sadd.s32 1, %s1159_s12 }
   0x7   : > { %p31_p0 = scmp.ge.s32.totalorder %s29_s16, 2  ;;  %p84_p1 = scmp.ne.s32.totalorder %s1143_s8, %s1139_s7 }
   0x8   : > { %p85_p2 = scmp.eq.s32.totalorder %s936_s14, 3  ;;  %p90_p5 = scmp.ne.s32.totalorder %s1139_s7, %s1135_s6 }
   0x9   : > { %s1426_s16 = smov (%p31_p0, %s29_s16), 0  ;;  %s1428_s17 = smov (!%p31_p0, %s33_s17), %s1159_s12 }
   0xa   : > { %s68_s18 = ssub.s32 %s1155_s11, %s1426_s16  ;;  %p1235_p3 = por %p85_p2, %p84_p1 }
   0xb   : > { %p35_p4 = scmp.ge.s32.totalorder %s1428_s17, 2  ;;  %p91_p6 = scmp.eq.s32.totalorder %s937_s15, 3 }
   0xc   : > { %p940_p7 = scmp.ge.s32.totalorder %s1163_s13, 1  ;;  %p125_p9 = scmp.lt.s32.totalorder %s1163_s13, 5 }
   0xd   : > { %s1430_s17 = smov (%p35_p4, %s1428_s17), 0  ;;  %p1244_p8 = por %p91_p6, %p90_p5 }
   0xe   : > { %s67_s21 = ssub.s32 %s1159_s12, %s1430_s17  ;;  %s74_s22 = sadd.s32 1, %s1143_s8 }
   0xf   : > { %s69_s23 = sor.u32 %s68_s18, %s67_s21  ;;  %p126_p10 = pnand %p940_p7, %p125_p9 }
  0x10   : > { %p72_p11 = scmp.eq.s32.totalorder %s69_s23, 0  ;;  %s149_s25 = sand.u32 (!%p126_p10), 1, %s1139_s7  }
  0x11   : > { %129 = sbr.rel (%p126_p10) target bundleno = 347 (0x15b), region = 24  ;;  %s942_s26 = sshll.u32 (!%p126_p10), %s1147_s9, 3 }
  0x12   : > { %s1253_s24 = scalar_select %p72_p11, %s1143_s8, %s74_s22  }
  0x13   : > { %s1259_s27 = sshll.u32 (!%p126_p10), %s149_s25, 4  ;;  %p153_p12 = scmp.lt.s32.totalorder (!%p126_p10), %s1151_s10, 1 }
  0x14   : > { %p155_p13 = scmp.lt.s32.totalorder (!%p126_p10), %s942_s26, 15  ;;  %s151_s14 = scalar_lea.vmem (!%p126_p10), [#allocation2], %s1259_s27 }
  0x15   : > { %s1285_s15 = smov (!%p126_p10), 0  }
  0x16   : > { %v166_v0 = vlaneseq  ;;  %s154_s28 = scalar_select %p153_p12, %s1151_s10, 1  ;;  %v1169_v6 = vmov 0.0  }
  0x17   : > { %s1432_s26 = smov (!%p155_p13, %s942_s26), 15 }
  0x18   : > { %v167_v1 = vand.u32 127, %v166_v0  ;;  %v169_v2 = vshrl.u32 %v166_v0, 7  ;;  %s943_s29 = sshll.u32 %s154_s28, 4 }
  0x19   : > { %s161_s30 = sadd.s32 %s943_s29, %s1432_s26 }
  0x1a   : > { %v170_v3 = vmul.u32 2, %v169_v2  ;;  %s944_s2 = sshll.u32 %s161_s30, 3 }
  0x1b   : > { %s1274_s5 = scalar_lea.vmem %s1410_s0, %s944_s2 }
  0x1c   : > { %vm1263_vm0 = vcmp.eq.s32.totalorder %v167_v1, %v170_v3  ;;  %v174_v5 = vadd.s32 1, %v170_v3 }
  0x1d   : > { %v1269_v7 = vsel %vm1263_vm0, 1.0, %v1169_v6 }
  0x1e   : > { %vm1276_vm1 = vcmp.eq.s32.totalorder %v167_v1, %v174_v5 }
  0x1f   : > { %v1282_v9 = vsel %vm1276_vm1, 1.0, %v1169_v6 }
  0x20 LB: >> { %v238_v10 = vsub.f32 %v1282_v9, %v1282_v9  ;;  %v1294_v11 = vsub.f32 %v1269_v7, %v1269_v7  ;;  %v1170_v12 = vmov 1.0   ;;  %s977_s18 = sshll.u32 %s1167_s15, 5  ;;  %vm192_vm2 = vcmask 64512   ;;  %s958_s22 = sshll.u32 %s1167_s15, 3  ;;  %s1167_s15 = sphi %s1285_s15, %s183_s15  }
  0x21   : >> { %953 = vmatpush.msk.msra.mxu3 %vm1276_vm1, %v1170_v12  ;;  %952 = vmatpush.msk.msra.mxu0 %vm1276_vm1, %v1170_v12  ;;  %s1307_s21 = scalar_lea.vmem %s1274_s5, %s977_s18  ;;  %s1356_s23 = scalar_lea.vmem %s151_s14, %s958_s22 [#allocation2]  ;;  %vm493_vm3 = vcmask 130048   ;;  %vm805_vm4 = vcmask 261248  }
  0x22   : >> { %265 = vmatpush.msra.mxu2 %v238_v10  ;;  %v239_v13 = vand.u32 4294901760, %v238_v10  ;;  %v1304_v14 = vand.u32 4294901760, %v1294_v11  ;;  %v951_v15 = vld [vmem:[%s1307_s21 + $0x8] sm:$0xff]  ;;  %v187_v18 = vld [vmem:[%s1307_s21] sm:$0xff]  ;;  %v964_v32 = vld [vmem:[%s1307_s21 + $0x18] sm:$0xff]  ;;  %s1171_s26 = smov 16  }
  0x23   : >> { %v194_v19 = vsel %vm192_vm2, %v951_v15, 0  ;;  %v343_v20 = vsel %vm192_vm2, %v187_v18, 0  ;;  %v961_v34 = vld [vmem:[%s1307_s21 + $0x10] sm:$0xff]  ;;  %v504_v35 = vsel %vm192_vm2, %v964_v32, 0  ;;  %s183_s15 = sadd.s32 1, %s1167_s15  }
  0x24   : >> { %955 = vmatpush.msk.msrb.mxu2 %vm1263_vm0, %v1170_v12  ;;  %v240_v16 = vsub.f32 %v238_v10, %v239_v13  ;;  %314 = vmatpush.msrb.mxu0 %v239_v13  ;;  %v389_v17 = vsub.f32 %v1294_v11, %v1304_v14  ;;  %v213_v21 = vand.u32 4294901760, %v194_v19  ;;  %v362_v24 = vand.u32 4294901760, %v343_v20  ;;  %p180_p0 = scmp.ge.s32.totalorder %s183_s15, 2  }
  0x25   : >> { %v653_v36 = vsel %vm192_vm2, %v961_v34, 0  ;;  %v523_v37 = vand.u32 4294901760, %v504_v35  ;;  %s972_s28 = sshll.u32 (%p180_p0), %s1147_s9, 1  ;;  %s973_s29 = sshll.u32 (%p180_p0), %s1151_s10, 2 }
  0x26   : >> { %v241_v22 = vand.u32 4294901760, %v240_v16  ;;  %v390_v23 = vand.u32 4294901760, %v389_v17  ;;  %v214_v25 = vsub.f32 %v194_v19, %v213_v21  ;;  %v363_v26 = vsub.f32 %v343_v20, %v362_v24  ;;  %s823_s30 = sshll.u32 (%p180_p0), %s151_s14, 4  ;;  %s820_s2 = sadd.s32 (%p180_p0), %s973_s29, %s972_s28  ;;  %s824_s30 = int_to_ptr.vmem [resolvable:$true] %s823_s30 }
  0x27   : >> { %v672_v38 = vand.u32 4294901760, %v653_v36  ;;  %v524_v39 = vsub.f32 %v504_v35, %v523_v37  ;;  %s974_s3 = sshll.u32 (%p180_p0), %s820_s2, 3  ;;  %s808_s15 = scalar_lea.sflag (%p180_p0), [#allocation3], %s149_s25 }
  0x28   : >> { %242 = vmatpush.msra.mxu1 %v241_v22  ;;  %391 = vmatpush.msrb.mxu3 %v390_v23  ;;  %v215_v27 = vand.u32 4294901760, %v214_v25  ;;  %v364_v28 = vand.u32 4294901760, %v363_v26  ;;  %s822_s21 = scalar_lea.hbm (%p180_p0), %s1411_s1, %s974_s3  ;;  %s1085_s27 = scalar_lea.hbm (%p180_p0), %s1411_s1, 64 }
  0x29   : >> { %244 = vmatmul.f32.vlgmr.msra.gmra.mxu1 %v213_v21  ;;  %268 = vmatmul.f32.vlgmr.msra.gmra.mxu2 %v214_v25  ;;  %v673_v40 = vsub.f32 %v653_v36, %v672_v38  ;;  %v525_v41 = vand.u32 4294901760, %v524_v39  ;;  %s825_s22 = sshll.u32 (%p180_p0), %s822_s21, 4  ;;  %s826_s22 = int_to_ptr.hbm [resolvable:$true] %s825_s22 }
  0x2a   : >> { %954 = vmatpush.msk.msrb.mxu1 %vm1276_vm1, %v1170_v12  ;;  %463 = vmatpush.msra.mxu2 %v1304_v14  ;;  %v216_v29 = vsub.f32 %v214_v25, %v215_v27  ;;  %v365_v30 = vsub.f32 %v363_v26, %v364_v28  ;;  %s1079_s5 = sshra.s32 (%p180_p0), %s826_s22, 4  ;;  %s1080_s5 = int_to_ptr.hbm [resolvable:$true] %s1079_s5 }
  0x2b   : >> { %292 = vmatmul.f32.vlgmr.msra.gmra.mxu3 %v215_v27  ;;  %v674_v42 = vand.u32 4294901760, %v673_v40  ;;  %v526_v43 = vsub.f32 %v524_v39, %v525_v41  ;;  %p1086_p5 = scmp.lt.s32.totalorder (%p180_p0), %s1080_s5, %s1411_s1 }
  0x2c   : >> { %956 = vmatpush.msk.msra.mxu1 %vm1263_vm0, %v1170_v12  ;;  %957 = vmatpush.msk.msra.mxu3 %vm1263_vm0, %v1170_v12  ;;  %v217_v31 = vand.u32 4294901760, %v216_v29  ;;  %v366_v33 = vand.u32 4294901760, %v365_v30 }
  0x2d   : >> { %v675_v44 = vsub.f32 %v673_v40, %v674_v42  ;;  %v527_v45 = vand.u32 4294901760, %v526_v43 }
  0x2e   : >> { %218 = vmatmul.f32.vlgmr.msra.gmra.mxu0 %v217_v31 }
  0x2f   : >> { %414 = vmatpush.msra.mxu0 %v1294_v11  ;;  %v676_v46 = vand.u32 4294901760, %v675_v44 }
  0x31   : >> { %338 = vmatmul.f32.vlgmr.msrb.gmra.mxu1 %v213_v21  ;;  %367 = vmatmul.f32.vlgmr.msrb.gmra.mxu2 %v366_v33 }
  0x32   : >> { %552 = vmatpush.msrb.mxu1 %v241_v22  ;;  %575 = vmatpush.msrb.mxu2 %v238_v10 }
  0x33   : >> { %393 = vmatmul.f32.vlgmr.msrb.gmra.mxu3 %v362_v24 }
  0x34   : >> { %966 = vmatpush.msk.msrb.mxu3 %vm1276_vm1, %v1170_v12 }
  0x36   : >> { %316 = vmatmul.f32.vlgmr.msrb.gmra.mxu0 %v213_v21 }
  0x37   : >> { %965 = vmatpush.msk.msrb.mxu0 %vm1276_vm1, %v1170_v12 }
  0x39   : >> { %441 = vmatmul.f32.vlgmr.msra.gmra.mxu1 %v364_v28  ;;  %465 = vmatmul.f32.vlgmr.msra.gmra.mxu2 %v362_v24 }
  0x3a   : >> { %967 = vmatpush.msk.msra.mxu1 %vm1276_vm1, %v1170_v12  ;;  %968 = vmatpush.msk.msra.mxu2 %vm1263_vm0, %v1170_v12 }
  0x3b   : >> { %487 = vmatmul.f32.vlgmr.msra.gmra.mxu3 %v362_v24 }
  0x3c   : >> { %701 = vmatpush.msra.mxu3 %v390_v23 }
  0x3e   : >> { %417 = vmatmul.f32.vlgmr.msra.gmra.mxu0 %v363_v26 }
  0x3f   : >> { %624 = vmatpush.msra.mxu0 %v239_v13 }
  0x41   : >> { %554 = vmatmul.f32.vlgmr.msrb.gmra.mxu1 %v523_v37  ;;  %578 = vmatmul.f32.vlgmr.msrb.gmra.mxu2 %v524_v39 }
  0x42   : >> { %969 = vmatpush.msk.msrb.mxu1 %vm1263_vm0, %v1170_v12  ;;  %773 = vmatpush.msrb.mxu2 %v1304_v14 }
  0x43   : >> { %602 = vmatmul.f32.vlgmr.msrb.gmra.mxu3 %v525_v41 }
  0x44   : >> { %970 = vmatpush.msk.msrb.mxu3 %vm1263_vm0, %v1170_v12 }
  0x46   : >> { %528 = vmatmul.f32.vlgmr.msrb.gmra.mxu0 %v527_v45 }
  0x47   : >> { %724 = vmatpush.msrb.mxu0 %v1294_v11 }
  0x49   : >> { %648 = vmatmul.f32.vlgmr.msra.gmra.mxu1 %v523_v37  ;;  %677 = vmatmul.f32.vlgmr.msra.gmra.mxu2 %v676_v46 }
  0x4b   : >> { %703 = vmatmul.f32.vlgmr.msra.gmra.mxu3 %v672_v38 }
  0x4e   : >> { %626 = vmatmul.f32.vlgmr.msra.gmra.mxu0 %v523_v37 }
  0x51   : >> { %751 = vmatmul.f32.vlgmr.msrb.gmra.mxu1 %v674_v42  ;;  %775 = vmatmul.f32.vlgmr.msrb.gmra.mxu2 %v672_v38 }
  0x53   : >> { %797 = vmatmul.f32.vlgmr.msrb.gmra.mxu3 %v672_v38 }
  0x56   : >> { %727 = vmatmul.f32.vlgmr.msrb.gmra.mxu0 %v673_v40 }
  0xa6   : >> { %v245_v47 = vpop.f32.mrf.mxu1 }
  0xab   : >> { %v219_v48 = vpop.f32.mrf.mxu0 }
  0xac   : >> { %v269_v49 = vpop.f32.mrf.mxu2  ;;  %v246_v50 = vadd.f32 %v245_v47, %v219_v48 }
  0xae   : >> { %v293_v51 = vpop.f32.mrf.mxu3  ;;  %v339_v52 = vpop.f32.mrf.mxu1  ;;  %v270_v53 = vadd.f32 %v269_v49, %v246_v50 }
  0xb0   : >> { %v294_v54 = vadd.f32 %v293_v51, %v270_v53 }
  0xb3   : >> { %v317_v55 = vpop.f32.mrf.mxu0 }
  0xb4   : >> { %v368_v56 = vpop.f32.mrf.mxu2  ;;  %v318_v57 = vadd.f32 %v317_v55, %v294_v54 }
  0xb6   : >> { %v394_v58 = vpop.f32.mrf.mxu3  ;;  %v340_v59 = vadd.f32 %v339_v52, %v318_v57  ;;  %v442_v60 = vpop.f32.mrf.mxu1 }
  0xb8   : >> { %v369_v61 = vadd.f32 %v368_v56, %v340_v59 }
  0xba   : >> { %v395_v62 = vadd.f32 %v394_v58, %v369_v61 }
  0xbb   : >> { %v418_v63 = vpop.f32.mrf.mxu0 }
  0xbc   : >> { %v466_v0 = vpop.f32.mrf.mxu2  ;;  %v419_v1 = vadd.f32 %v418_v63, %v395_v62 }
  0xbe   : >> { %v488_v2 = vpop.f32.mrf.mxu3  ;;  %v443_v3 = vadd.f32 %v442_v60, %v419_v1  ;;  %v555_v6 = vpop.f32.mrf.mxu1 }
  0xc0   : >> { %v467_v5 = vadd.f32 %v466_v0, %v443_v3 }
  0xc2   : >> { %v489_v10 = vadd.f32 %v488_v2, %v467_v5 }
  0xc3   : >> { %v529_v11 = vpop.f32.mrf.mxu0 }
  0xc4   : >> { %v579_v12 = vpop.f32.mrf.mxu2  ;;  %494 = vst.msk [vmem:[%s1356_s23] sm:$0xff] %vm493_vm3, %v489_v10  ;;  %v556_v13 = vadd.f32 %v555_v6, %v529_v11 }
  0xc6   : >> { %v603_v14 = vpop.f32.mrf.mxu3  ;;  %v580_v15 = vadd.f32 %v579_v12, %v556_v13  ;;  %v649_v16 = vpop.f32.mrf.mxu1 }
  0xc8   : >> { %v604_v17 = vadd.f32 %v603_v14, %v580_v15 }
  0xcb   : >> { %v627_v18 = vpop.f32.mrf.mxu0 }
  0xcc   : >> { %v678_v19 = vpop.f32.mrf.mxu2  ;;  %v628_v20 = vadd.f32 %v627_v18, %v604_v17 }
  0xce   : >> { %v704_v21 = vpop.f32.mrf.mxu3  ;;  %v650_v22 = vadd.f32 %v649_v16, %v628_v20  ;;  %v752_v26 = vpop.f32.mrf.mxu1 }
  0xd0   : >> { %v679_v23 = vadd.f32 %v678_v19, %v650_v22 }
  0xd2   : >> { %v705_v24 = vadd.f32 %v704_v21, %v679_v23 }
  0xd3   : >> { %v728_v25 = vpop.f32.mrf.mxu0 }
  0xd4   : >> { %v729_v27 = vadd.f32 %v728_v25, %v705_v24  ;;  %v776_v28 = vpop.f32.mrf.mxu2 }
  0xd6   : >> { %v753_v29 = vadd.f32 %v752_v26, %v729_v27  ;;  %v798_v30 = vpop.f32.mrf.mxu3 }
  0xd8   : >> { %v777_v31 = vadd.f32 %v776_v28, %v753_v29 }
  0xda   : >> { %v799_v32 = vadd.f32 %v798_v30, %v777_v31 }
  0xdc   : >> { %802 = vrot.lane.b32.xlu0 %v799_v32, %s1171_s26 }
 0x14b   : > { %182 = sbr.rel (!%p180_p0) target bundleno = 32 (0x20), region = 71 }
 0x14e   : >> { %v803_v33 = vpop.permute.xlu0 %802 }
 0x14f   : >> { %806 = vst.msk [vmem:[%s1356_s23] sm:$0xff] %vm805_vm4, %v803_v33  ;;  %s1081_s23 = scalar_lea.hbm (%p180_p0), %s1080_s5, 16 }
 0x150   : > { %p1082_p1 = scmp.ne.s32.totalorder %s1080_s5, %s1081_s23  ;;  %p1087_p6 = scmp.lt.s32.totalorder %s1085_s27, %s1081_s23 }
 0x152   : > { %p1083_p2 = pnand %p1082_p1, %p1235_p3  ;;  %p1088_p7 = por %p1087_p6, %p1086_p5 }
 0x154   : > { %p1084_p4 = pneg %p1083_p2 }
 0x156   : > { %p1089_p9 = pnand %p1088_p7, %p1084_p4 }
 0x158   : > { %1092 = shalt.err (!%p1089_p9)
}
 0x159   : > { %s1172_s25 = smov 128   ;;  %s1173_s28 = smov 8  }
 0x15a   : > { %981 = dma.vmem_to_hbm [thread:$0]  (%p1235_p3), %s824_s30, 256, %s826_s22, %s808_s15, %s1172_s25, %s1172_s25, %s1173_s28  }
 0x15b PF: > { %p987_p10 = scmp.ge.s32.totalorder %s1163_s13, 2  ;;  %s840_s29 = sand.u32 1, %s1135_s6  }
 0x15c   : > { %s841_s2 = scalar_lea.sflag [#allocation3], %s840_s29 }
 0x15d   : > { %p984_p11 = pnand %p987_p10, %p1244_p8 }
 0x15f   : > { %p985_p12 = pneg %p984_p11 }
 0x161   : > { %1130 = dma.done.wait (%p985_p12), %s841_s2, 256  }
 0x162   : > { %1132 = vsyncadd (%p985_p12), %s841_s2, 4294967040  ;;  %s14_s13 = sadd.s32 1, %s1163_s13   ;;  %s1418_s6 = smov %s1139_s7 }
 0x163   : > { %p11_p13 = scmp.ge.s32.totalorder %s14_s13, 6   ;;  %s1419_s7 = smov %s1143_s8 }
 0x164   : > { %s1420_s8 = smov %s1253_s24  ;;  %s1421_s9 = smov %s1155_s11 }
 0x165   : > { %s1422_s10 = smov %s1159_s12  ;;  %s1423_s11 = smov %s1426_s16 }
 0x166   : > { %s1424_s12 = smov %s1430_s17  ;;  %13 = sbr.rel (!%p11_p13) target bundleno = 5 (0x5), region = 82 }
 0x16b   :  { %847 = vsyncpa [#allocation3], 1 }
 0x16c   :  { %849 = vsyncpa [#allocation3 + $0x1], 1 }

</bundles_post_ra>
